<compile_context>
chip_gen: v5e
topology: v5e:2x2
jax: 0.10.0
libtpu: 0.0.40
codegen_flags: <defaults>
</compile_context>

<pallas_src>
import jax
import jax.numpy as jnp
from jax.experimental import pallas as pl
from jax.experimental.pallas import tpu as pltpu

# ---- config (mirrors GATEmbedder.__init__ arguments) ----
NUM_ACTIVITIES = 10
NUM_LAYERS = 2
NUM_HEADS = 4
HIDDEN = 32
DO_POOLING = 1
HEAD_DIM = HIDDEN // NUM_HEADS      # BasicGNN splits hidden_channels across heads (concat=True)
NEG_SLOPE = 0.2                     # GATConv leaky_relu default
EDGE_DIM = HIDDEN                   # synthetic EdgeEmbedder output size
MASK_NEG = -1e30                    # additive mask for absent edges (bf16-representable)


# ----------------------------------------------------------------------------
# Fused Pallas kernel: grid = (num_graphs [parallel], num_layers [arbitrary])
# ----------------------------------------------------------------------------
def make_gat_kernel(num_heads: int, hidden: int, npg: int, do_pooling: bool):
    """Kernel refs per grid step (g, l):
         x_ref    [npg, HC]        node features of graph block g (only read at l == 0)
         pool_ref [1, npg]         pre-scaled scatter_mean row of graph g
         bdm_ref  [H*npg, HC]      bf16 0/1 block-diagonal head mask (static)
         w_ref    [HC, HC]         layer-l lin_src weight
         ap_ref   [HC, 2H]         layer-l fused [att_dst_blockdiag | att_src_blockdiag]
         ae_ref   [npg, H, npg]    bf16 edge-attention bias (mask folded in), layout (i, h, j)
         b_ref    [1, HC]          layer-l output bias
         out_ref  [1, HC] (pool) / [npg, HC] (no pool)
         h_scr    [npg, HC] f32    carried node features across the layer axis
    """
    def kernel(x_ref, pool_ref, bdm_ref, w_ref, ap_ref, ae_ref, b_ref, out_ref, h_scr):
        l = pl.program_id(1)
        last = pl.num_programs(1) - 1

        @pl.when(l == 0)
        def _():
            h_scr[...] = x_ref[...]

        h = h_scr[...]                                                      # [npg, HC] f32
        hw = jnp.dot(h, w_ref[...], preferred_element_type=jnp.float32)     # [npg, HC]

        # both attention projections in ONE MXU call, then one small transpose
        proj = jnp.dot(hw, ap_ref[...], preferred_element_type=jnp.float32)  # [npg, 2H]
        a_dst = proj[:, :num_heads]                  # [npg, H]  (node as target i)
        a_src_t = proj[:, num_heads:].T              # [H, npg]  (node as source j)

        # all heads' logits / softmax in one pass (layout [i, h, j]); math in f32 (v5e-safe)
        ae = ae_ref[...].astype(jnp.float32)                                 # bf16 -> f32
        raw = a_dst[:, :, None] + a_src_t[None, :, :] + ae                   # [npg, H, npg]
        logits = jnp.maximum(raw, NEG_SLOPE * raw)                           # leaky_relu(0.2)
        m = jnp.max(logits, axis=-1, keepdims=True)
        e = jnp.exp(logits - m)                      # masked entries underflow to exactly 0
        inv = pl.reciprocal(jnp.sum(e, axis=-1, keepdims=True), approx=True)
        alpha = e * inv                                                      # [npg, H, npg] f32

        # all-heads AV as ONE block-diagonal matmul, bf16 operands / f32 accumulation:
        #   out[i, h*C+c] = sum_j alpha[i, h, j] * hw[j, h*C+c]
        alpha_flat = jnp.concatenate(
            [alpha[:, hd, :] for hd in range(num_heads)], axis=-1
        ).astype(jnp.bfloat16)                                               # [npg, H*npg]
        hw_bf = hw.astype(jnp.bfloat16)
        hw_bd = jnp.concatenate([hw_bf] * num_heads, axis=0) * bdm_ref[...]  # [H*npg, HC]
        out_nodes = jnp.dot(alpha_flat, hw_bd,
                            preferred_element_type=jnp.float32) + b_ref[...]  # [npg, HC]

        @pl.when(l < last)
        def _():
            h_scr[...] = jnp.maximum(out_nodes, 0.0)  # ReLU between layers (BasicGNN act)

        @pl.when(l == last)
        def _():
            if do_pooling:
                # scatter_mean of this graph block as a pre-scaled row matmul
                out_ref[...] = jnp.dot(pool_ref[...], out_nodes,
                                       preferred_element_type=jnp.float32)   # [1, HC]
            else:
                out_ref[...] = out_nodes
    return kernel


def fused_gat(x, pool3, bd_mask, ws, aps, aes, bs, *, num_graphs, npg, do_pooling):
    grid = (num_graphs, NUM_LAYERS)

    in_specs = [
        pl.BlockSpec((npg, HIDDEN), lambda g, l: (g, 0)),                          # x
        pl.BlockSpec((None, 1, npg), lambda g, l: (g, 0, 0)),                      # pool3
        pl.BlockSpec((NUM_HEADS * npg, HIDDEN), lambda g, l: (0, 0)),              # bd_mask
        pl.BlockSpec((None, HIDDEN, HIDDEN), lambda g, l: (l, 0, 0)),              # ws
        pl.BlockSpec((None, HIDDEN, 2 * NUM_HEADS), lambda g, l: (l, 0, 0)),       # aps
        pl.BlockSpec((None, None, npg, NUM_HEADS, npg),
                     lambda g, l: (l, g, 0, 0, 0)),                                # aes (bf16)
        pl.BlockSpec((None, 1, HIDDEN), lambda g, l: (l, 0, 0)),                   # bs
    ]
    if do_pooling:
        out_shape = jax.ShapeDtypeStruct((num_graphs, 1, HIDDEN), jnp.float32)
        out_spec = pl.BlockSpec((None, 1, HIDDEN), lambda g, l: (g, 0, 0))
        out_block_bytes = HIDDEN * 4
    else:
        out_shape = jax.ShapeDtypeStruct((num_graphs * npg, HIDDEN), jnp.float32)
        out_spec = pl.BlockSpec((npg, HIDDEN), lambda g, l: (g, 0))
        out_block_bytes = npg * HIDDEN * 4

    # explicit VMEM budget sized to the actual (double-buffered) blocks + scratch, with headroom
    block_bytes = (npg * HIDDEN * 4                      # x
                   + npg * 4                             # pool row
                   + NUM_HEADS * npg * HIDDEN * 2        # bd_mask (bf16)
                   + HIDDEN * HIDDEN * 4                 # W
                   + HIDDEN * 2 * NUM_HEADS * 4          # fused attention projection
                   + npg * NUM_HEADS * npg * 2           # ae (bf16)
                   + HIDDEN * 4                          # bias
                   + out_block_bytes)
    scratch_bytes = npg * HIDDEN * 4
    vmem_limit = max(8 * (2 * block_bytes + scratch_bytes), 4 * 1024 * 1024)

    out = pl.pallas_call(
        make_gat_kernel(NUM_HEADS, HIDDEN, npg, do_pooling),
        out_shape=out_shape,
        grid_spec=pltpu.PrefetchScalarGridSpec(
            num_scalar_prefetch=0,
            grid=grid,
            in_specs=in_specs,
            out_specs=out_spec,
            scratch_shapes=[pltpu.VMEM((npg, HIDDEN), jnp.float32)],
        ),
        compiler_params=pltpu.CompilerParams(
            dimension_semantics=("parallel", "arbitrary"),
            vmem_limit_bytes=int(vmem_limit),
        ),
    )(x, pool3, bd_mask, ws, aps, aes, bs)
    return out[:, 0, :] if do_pooling else out


# ----------------------------------------------------------------------------
# Parameters
# ----------------------------------------------------------------------------
def init_params(key):
    keys = jax.random.split(key, 3 + NUM_LAYERS * 6)
    it = iter(keys)

    def nrm(shape, scale=0.2):
        return scale * jax.random.normal(next(it), shape, jnp.float32)

    params = {
        "emb": nrm((NUM_ACTIVITIES, HIDDEN), 1.0),        # nn.Embedding weight
        # TODO(synk): EdgeEmbedder source unavailable; synthesized as Linear(1 -> hidden) on freq feature.
        "edge_w": nrm((1, EDGE_DIM)),
        "edge_b": nrm((EDGE_DIM,)),
        "layers": [],
    }
    for _ in range(NUM_LAYERS):
        params["layers"].append({
            "w": nrm((HIDDEN, HIDDEN)),                   # lin_src (bias=False)
            "att_src": nrm((NUM_HEADS, HEAD_DIM)),
            "att_dst": nrm((NUM_HEADS, HEAD_DIM)),
            "att_edge": nrm((NUM_HEADS, HEAD_DIM)),
            "lin_edge_w": nrm((EDGE_DIM, HIDDEN)),        # lin_edge (bias=False)
            "bias": nrm((HIDDEN,)),
        })
    return params


# ----------------------------------------------------------------------------
# Static graph structures (topology only) -- built ONCE outside the hot path
# ----------------------------------------------------------------------------
def precompute_graph_structs(edge_index, batch, num_nodes, num_graphs, nodes_per_graph):
    src, dst = edge_index[0], edge_index[1]
    n, g, npg = num_nodes, num_graphs, nodes_per_graph
    arange_n = jnp.arange(n, dtype=src.dtype)
    src_sl = jnp.concatenate([src, arange_n])     # with self loops
    dst_sl = jnp.concatenate([dst, arange_n])
    deg = jnp.zeros((n,), jnp.float32).at[dst].add(1.0)

    g_e = dst_sl // npg                           # graph block of each (self-loop-augmented) edge
    dst_loc = dst_sl % npg
    src_loc = src_sl % npg

    # per-graph additive mask: 0 where edge j->i exists (incl. self loops), MASK_NEG elsewhere
    mask_blocked = jnp.full((g, npg, npg), MASK_NEG, jnp.float32)
    mask_blocked = mask_blocked.at[g_e, dst_loc, src_loc].set(0.0)

    # scatter_mean pooling as pre-scaled per-graph rows [G, 1, npg]
    onehot = (batch[None, :] == jnp.arange(g)[:, None]).astype(jnp.float32)       # [G, N]
    counts = jnp.maximum(onehot.sum(axis=1, keepdims=True), 1.0)
    pool = onehot / counts
    pool3 = pool.reshape(g, g, npg)[jnp.arange(g), jnp.arange(g)][:, None, :]      # [G, 1, npg]

    # block-diagonal head mask for the fused all-heads AV matmul (bf16 0/1)
    row_head = jnp.arange(NUM_HEADS * npg) // npg
    col_head = jnp.arange(HIDDEN) // HEAD_DIM
    bd_mask = (row_head[:, None] == col_head[None, :]).astype(jnp.bfloat16)        # [H*npg, HC]

    return dict(dst=dst, deg=deg, g_e=g_e, dst_loc=dst_loc, src_loc=src_loc,
                mask_blocked=mask_blocked, pool3=pool3, bd_mask=bd_mask)


# ----------------------------------------------------------------------------
# Forward: glue in plain JAX, whole GNN hot path in ONE Pallas kernel
# ----------------------------------------------------------------------------
def gat_embedder_forward(params, x_ids, edge_attr, structs, num_graphs, nodes_per_graph):
    n = x_ids.shape[0]
    npg = nodes_per_graph
    node = params["emb"][x_ids[:, 0]]                                      # [N, HC]  (gather: glue)

    # edge embedder (synthetic) + add_self_loops(fill_value='mean')
    edge_emb = edge_attr @ params["edge_w"] + params["edge_b"][None, :]    # [E, EDGE_DIM]
    loop_attr = jnp.zeros((n, EDGE_DIM), jnp.float32).at[structs["dst"]].add(edge_emb)
    loop_attr = loop_attr / jnp.maximum(structs["deg"], 1.0)[:, None]
    edge_emb_sl = jnp.concatenate([edge_emb, loop_attr], axis=0)           # [E', EDGE_DIM]

    eye_h = jnp.eye(NUM_HEADS, dtype=jnp.float32)
    ws, aps, bs, aes = [], [], [], []
    for lp in params["layers"]:
        # block-diagonal per-head attention projections, fused [a_dst | a_src] -> [HC, 2H]
        adst_bd = (lp["att_dst"][:, None, :] * eye_h[:, :, None]).reshape(NUM_HEADS, HIDDEN).T
        asrc_bd = (lp["att_src"][:, None, :] * eye_h[:, :, None]).reshape(NUM_HEADS, HIDDEN).T
        aps.append(jnp.concatenate([adst_bd, asrc_bd], axis=1))            # [HC, 2H]
        ws.append(lp["w"])
        bs.append(lp["bias"][None, :])

        # per-edge edge-feature attention term alpha_e[e, h]
        m_mat = jnp.einsum("dhc,hc->dh",
                           lp["lin_edge_w"].reshape(EDGE_DIM, NUM_HEADS, HEAD_DIM),
                           lp["att_edge"])                                 # [EDGE_DIM, H]
        alpha_e = edge_emb_sl @ m_mat                                      # [E', H]
        base = jnp.broadcast_to(structs["mask_blocked"][..., None],
                                (num_graphs, npg, npg, NUM_HEADS))         # [G, i, j, H]
        ae_l = base.at[structs["g_e"], structs["dst_loc"], structs["src_loc"]].set(alpha_e)
        aes.append(ae_l.transpose(0, 1, 3, 2))                             # [G, i, H, j]

    ws = jnp.stack(ws, 0)                                                  # [L, HC, HC]
    aps = jnp.stack(aps, 0)                                                # [L, HC, 2H]
    bs = jnp.stack(bs, 0)                                                  # [L, 1, HC]
    aes = jnp.stack(aes, 0).astype(jnp.bfloat16)                           # [L, G, npg, H, npg]

    return fused_gat(node, structs["pool3"], structs["bd_mask"], ws, aps, aes, bs,
                     num_graphs=num_graphs, npg=npg, do_pooling=bool(DO_POOLING))


# ----------------------------------------------------------------------------
# Pure-JAX f32 reference (dense formulation) for the correctness check
# ----------------------------------------------------------------------------
def _ref_layer(x, w, asrc, adst, ae_dense, mask, bias, apply_relu):
    n = x.shape[0]
    h = x @ w
    hv = h.reshape(n, NUM_HEADS, HEAD_DIM)
    a_src = jnp.einsum("nhc,hc->hn", hv, asrc)
    a_dst = jnp.einsum("nhc,hc->hn", hv, adst)
    logits = a_dst[:, :, None] + a_src[:, None, :] + ae_dense
    logits = jnp.where(logits >= 0, logits, NEG_SLOPE * logits)
    logits = jnp.where(mask[None] > 0, logits, -1e30)
    m = logits.max(-1, keepdims=True)
    e = jnp.where(mask[None] > 0, jnp.exp(logits - m), 0.0)
    alpha = e / (e.sum(-1, keepdims=True) + 1e-16)
    out = jnp.einsum("hij,jhc->ihc", alpha, hv).reshape(n, HIDDEN) + bias[None, :]
    return jnp.maximum(out, 0.0) if apply_relu else out


def reference_forward(params, x_ids, edge_index, edge_attr, batch, num_graphs):
    n = x_ids.shape[0]
    node = params["emb"][x_ids[:, 0]]
    edge_emb = edge_attr @ params["edge_w"] + params["edge_b"][None, :]
    src, dst = edge_index[0], edge_index[1]
    deg = jnp.zeros((n,), jnp.float32).at[dst].add(1.0)
    loop_attr = jnp.zeros((n, EDGE_DIM), jnp.float32).at[dst].add(edge_emb)
    loop_attr = loop_attr / jnp.maximum(deg, 1.0)[:, None]
    arange_n = jnp.arange(n, dtype=src.dtype)
    src_sl = jnp.concatenate([src, arange_n])
    dst_sl = jnp.concatenate([dst, arange_n])
    edge_emb_sl = jnp.concatenate([edge_emb, loop_attr], axis=0)
    mask = jnp.zeros((n, n), jnp.float32).at[dst_sl, src_sl].set(1.0)
    h = node
    for l in range(NUM_LAYERS):
        lp = params["layers"][l]
        m_mat = jnp.einsum("dhc,hc->dh",
                           lp["lin_edge_w"].reshape(EDGE_DIM, NUM_HEADS, HEAD_DIM),
                           lp["att_edge"])
        alpha_e = edge_emb_sl @ m_mat
        ae_dense = jnp.zeros((NUM_HEADS, n, n), jnp.float32).at[:, dst_sl, src_sl].set(alpha_e.T)
        h = _ref_layer(h, lp["w"], lp["att_src"], lp["att_dst"], ae_dense, mask,
                       lp["bias"], apply_relu=(l < NUM_LAYERS - 1))
    if DO_POOLING:
        onehot = (batch[None, :] == jnp.arange(num_graphs)[:, None]).astype(jnp.float32)
        counts = onehot.sum(axis=1, keepdims=True)
        h = (onehot @ h) / jnp.maximum(counts, 1.0)
    return h


# ----------------------------------------------------------------------------
if __name__ == "__main__":
    key = jax.random.PRNGKey(0)
    k_param, k_x, k_e = jax.random.split(key, 3)

    params = init_params(k_param)

    # graph: 2 graphs x 8 nodes = 16 nodes, 32 directed edges (ring + skip-3), no dupes/self loops
    num_nodes, num_graphs, nodes_per_graph = 16, 2, 8
    edges = []
    for g in range(num_graphs):
        off = g * nodes_per_graph
        for j in range(nodes_per_graph):
            edges.append((off + j, off + (j + 1) % nodes_per_graph))
            edges.append((off + j, off + (j + 3) % nodes_per_graph))
    edge_index = jnp.array([[e[0] for e in edges], [e[1] for e in edges]], dtype=jnp.int32)

    x_ids = jax.random.randint(k_x, (num_nodes, 1), 0, NUM_ACTIVITIES, dtype=jnp.int32)   # graph.x
    edge_attr = jax.random.uniform(k_e, (edge_index.shape[1], 1), dtype=jnp.float32)      # freq feat
    batch = jnp.repeat(jnp.arange(num_graphs, dtype=jnp.int32), nodes_per_graph)          # graph.batch

    # per-graph blocking assumptions (contiguous, equal-sized graph blocks, intra-graph edges only)
    assert bool(jnp.all(batch == jnp.arange(num_nodes) // nodes_per_graph))
    assert bool(jnp.all(edge_index[0] // nodes_per_graph == edge_index[1] // nodes_per_graph))

    # static topology-only structures: built once, outside the per-step hot path
    structs = precompute_graph_structs(edge_index, batch, num_nodes, num_graphs, nodes_per_graph)

    fwd = jax.jit(gat_embedder_forward, static_argnums=(4, 5))
    out = jax.block_until_ready(
        fwd(params, x_ids, edge_attr, structs, num_graphs, nodes_per_graph))

    ref = reference_forward(params, x_ids, edge_index, edge_attr, batch, num_graphs)
    assert out.shape == (num_graphs, HIDDEN), out.shape
    assert bool(jnp.all(jnp.isfinite(out))), "non-finite output"
    # bf16 ae / bf16 AV operands + approx reciprocal => ~1% deviation from the f32 reference
    assert jnp.allclose(out, ref, atol=2e-2, rtol=2e-2), (out, ref)

    print("KERNEL_OK")
</pallas_src>

<mosaic_0001>
module attributes {stable_mosaic.version = 11 : i64} {
  func.func @kernel(%arg0: i32, %arg1: i32, %arg2: memref<8x32xf32, #tpu.memory_space<vmem>>, %arg3: memref<1x1x8xf32, #tpu.memory_space<vmem>>, %arg4: memref<32x32xbf16, #tpu.memory_space<vmem>>, %arg5: memref<1x32x32xf32, #tpu.memory_space<vmem>>, %arg6: memref<1x32x8xf32, #tpu.memory_space<vmem>>, %arg7: memref<1x1x8x4x8xbf16, #tpu.memory_space<vmem>>, %arg8: memref<1x1x32xf32, #tpu.memory_space<vmem>>, %arg9: memref<1x1x32xf32, #tpu.memory_space<vmem>>, %arg10: memref<8x32xf32, #tpu.memory_space<vmem>>) attributes {dimension_semantics = [#tpu.dimension_semantics<parallel>, #tpu.dimension_semantics<arbitrary>], iteration_bounds = array<i64: 2, 2>, scalar_prefetch = 0 : i64, scratch_operands = 1 : i64, tpu.core_type = #tpu.core_type<tc>, window_params = [{transform_indices = @transform_0, window_bounds = array<i64: 8, 32>}, {transform_indices = @transform_1, window_bounds = array<i64: 1, 1, 8>}, {pipeline_mode = #tpu.pipeline_mode<synchronous>, transform_indices = @transform_2, window_bounds = array<i64: 32, 32>}, {transform_indices = @transform_3, window_bounds = array<i64: 1, 32, 32>}, {transform_indices = @transform_4, window_bounds = array<i64: 1, 32, 8>}, {transform_indices = @transform_5, window_bounds = array<i64: 1, 1, 8, 4, 8>}, {transform_indices = @transform_6, window_bounds = array<i64: 1, 1, 32>}, {transform_indices = @transform_7, window_bounds = array<i64: 1, 1, 32>}]} {
    %c0_i32 = arith.constant 0 : i32
    %0 = arith.cmpi eq, %arg1, %c0_i32 : i32
    %1 = arith.extui %0 : i1 to i32
    %c0_i32_0 = arith.constant 0 : i32
    %2 = arith.cmpi ne, %1, %c0_i32_0 : i32
    scf.if %2 {
      %c0_26 = arith.constant 0 : index
      %c0_27 = arith.constant 0 : index
      %60 = vector.load %arg2[%c0_26, %c0_27] : memref<8x32xf32, #tpu.memory_space<vmem>>, vector<8x32xf32>
      %c0_28 = arith.constant 0 : index
      %c0_29 = arith.constant 0 : index
      %61 = vector.load %arg10[%c0_28, %c0_29] : memref<8x32xf32, #tpu.memory_space<vmem>>, vector<8x32xf32>
      tpu.vector_store %arg10[%c0_28, %c0_29], %60 {strides = array<i32>} : memref<8x32xf32, #tpu.memory_space<vmem>>, vector<8x32xf32>,
    } else {
    }
    %c0 = arith.constant 0 : index
    %c0_1 = arith.constant 0 : index
    %3 = vector.load %arg10[%c0, %c0_1] : memref<8x32xf32, #tpu.memory_space<vmem>>, vector<8x32xf32>
    %c0_2 = arith.constant 0 : index
    %c0_3 = arith.constant 0 : index
    %c0_4 = arith.constant 0 : index
    %4 = vector.load %arg5[%c0_2, %c0_3, %c0_4] : memref<1x32x32xf32, #tpu.memory_space<vmem>>, vector<1x32x32xf32>
    %5 = vector.shape_cast %4 : vector<1x32x32xf32> to vector<32x32xf32>
    %cst = arith.constant dense<0.000000e+00> : vector<8x32xf32>
    %6 = tpu.matmul %3, %5, %cst {dimension_numbers = #tpu.dot_dimension_numbers<[1], [0], [0], [1], [0, 0, 1, 1], [], []>} : vector<8x32xf32>, vector<32x32xf32>, vector<8x32xf32> -> vector<8x32xf32>
    %c0_5 = arith.constant 0 : index
    %c0_6 = arith.constant 0 : index
    %c0_7 = arith.constant 0 : index
    %7 = vector.load %arg6[%c0_5, %c0_6, %c0_7] : memref<1x32x8xf32, #tpu.memory_space<vmem>>, vector<1x32x8xf32>
    %8 = vector.shape_cast %7 : vector<1x32x8xf32> to vector<32x8xf32>
    %cst_8 = arith.constant dense<0.000000e+00> : vector<8x8xf32>
    %9 = tpu.matmul %6, %8, %cst_8 {dimension_numbers = #tpu.dot_dimension_numbers<[1], [0], [0], [1], [0, 0, 1, 1], [], []>} : vector<8x32xf32>, vector<32x8xf32>, vector<8x8xf32> -> vector<8x8xf32>
    %10 = vector.extract_strided_slice %9 {offsets = [0, 0], sizes = [8, 4], strides = [1, 1]} : vector<8x8xf32> to vector<8x4xf32>
    %11 = vector.extract_strided_slice %9 {offsets = [0, 4], sizes = [8, 4], strides = [1, 1]} : vector<8x8xf32> to vector<8x4xf32>
    %12 = tpu.transpose %11, [1, 0] : vector<8x4xf32> -> vector<4x8xf32>
    %c0_9 = arith.constant 0 : index
    %c0_10 = arith.constant 0 : index
    %c0_11 = arith.constant 0 : index
    %c0_12 = arith.constant 0 : index
    %c0_13 = arith.constant 0 : index
    %13 = vector.load %arg7[%c0_9, %c0_10, %c0_11, %c0_12, %c0_13] : memref<1x1x8x4x8xbf16, #tpu.memory_space<vmem>>, vector<1x1x8x4x8xbf16>
    %14 = vector.shape_cast %13 : vector<1x1x8x4x8xbf16> to vector<8x4x8xbf16>
    %15 = arith.extf %14 : vector<8x4x8xbf16> to vector<8x4x8xf32>
    %16 = vector.shape_cast %10 : vector<8x4xf32> to vector<8x4x1xf32>
    %17 = vector.shape_cast %12 : vector<4x8xf32> to vector<1x4x8xf32>
    %18 = vector.broadcast %16 : vector<8x4x1xf32> to vector<8x4x8xf32>
    %19 = vector.broadcast %17 : vector<1x4x8xf32> to vector<8x4x8xf32>
    %20 = arith.addf %18, %19 : vector<8x4x8xf32>
    %21 = arith.addf %20, %15 : vector<8x4x8xf32>
    %cst_14 = arith.constant 2.000000e-01 : f32
    %22 = vector.broadcast %cst_14 : f32 to vector<8x4x8xf32>
    %23 = arith.mulf %22, %21 : vector<8x4x8xf32>
    %24 = arith.maximumf %21, %23 : vector<8x4x8xf32>
    %cst_15 = arith.constant dense<0xFF800000> : vector<8x4xf32>
    %25 = vector.multi_reduction <maximumf>, %24, %cst_15 [2] : vector<8x4x8xf32> to vector<8x4xf32>
    %26 = vector.shape_cast %25 : vector<8x4xf32> to vector<8x4x1xf32>
    %27 = vector.broadcast %26 : vector<8x4x1xf32> to vector<8x4x8xf32>
    %28 = arith.subf %24, %27 : vector<8x4x8xf32>
    %29 = math.exp %28 : vector<8x4x8xf32>
    %cst_16 = arith.constant dense<0.000000e+00> : vector<8x4xf32>
    %30 = vector.multi_reduction <add>, %29, %cst_16 [2] : vector<8x4x8xf32> to vector<8x4xf32>
    %31 = vector.shape_cast %30 : vector<8x4xf32> to vector<8x4x1xf32>
    %32 = tpu.reciprocal %31 {approx = true} : vector<8x4x1xf32> -> vector<8x4x1xf32>
    %33 = vector.broadcast %32 : vector<8x4x1xf32> to vector<8x4x8xf32>
    %34 = arith.mulf %29, %33 : vector<8x4x8xf32>
    %35 = vector.extract_strided_slice %34 {offsets = [0, 0, 0], sizes = [8, 1, 8], strides = [1, 1, 1]} : vector<8x4x8xf32> to vector<8x1x8xf32>
    %36 = vector.shape_cast %35 : vector<8x1x8xf32> to vector<8x8xf32>
    %37 = vector.extract_strided_slice %34 {offsets = [0, 1, 0], sizes = [8, 1, 8], strides = [1, 1, 1]} : vector<8x4x8xf32> to vector<8x1x8xf32>
    %38 = vector.shape_cast %37 : vector<8x1x8xf32> to vector<8x8xf32>
    %39 = vector.extract_strided_slice %34 {offsets = [0, 2, 0], sizes = [8, 1, 8], strides = [1, 1, 1]} : vector<8x4x8xf32> to vector<8x1x8xf32>
    %40 = vector.shape_cast %39 : vector<8x1x8xf32> to vector<8x8xf32>
    %41 = vector.extract_strided_slice %34 {offsets = [0, 3, 0], sizes = [8, 1, 8], strides = [1, 1, 1]} : vector<8x4x8xf32> to vector<8x1x8xf32>
    %42 = vector.shape_cast %41 : vector<8x1x8xf32> to vector<8x8xf32>
    %43 = tpu.concatenate %36, %38, %40, %42 in 1 : vector<8x8xf32>, vector<8x8xf32>, vector<8x8xf32>, vector<8x8xf32> -> vector<8x32xf32>
    %44 = arith.truncf %43 : vector<8x32xf32> to vector<8x32xbf16>
    %45 = arith.truncf %6 : vector<8x32xf32> to vector<8x32xbf16>
    %46 = tpu.concatenate %45, %45, %45, %45 in 0 : vector<8x32xbf16>, vector<8x32xbf16>, vector<8x32xbf16>, vector<8x32xbf16> -> vector<32x32xbf16>
    %c0_17 = arith.constant 0 : index
    %c0_18 = arith.constant 0 : index
    %47 = vector.load %arg4[%c0_17, %c0_18] : memref<32x32xbf16, #tpu.memory_space<vmem>>, vector<32x32xbf16>
    %48 = arith.mulf %46, %47 : vector<32x32xbf16>
    %cst_19 = arith.constant dense<0.000000e+00> : vector<8x32xf32>
    %49 = tpu.matmul %44, %48, %cst_19 {dimension_numbers = #tpu.dot_dimension_numbers<[1], [0], [0], [1], [0, 0, 1, 1], [], []>} : vector<8x32xbf16>, vector<32x32xbf16>, vector<8x32xf32> -> vector<8x32xf32>
    %c0_20 = arith.constant 0 : index
    %c0_21 = arith.constant 0 : index
    %c0_22 = arith.constant 0 : index
    %50 = vector.load %arg8[%c0_20, %c0_21, %c0_22] : memref<1x1x32xf32, #tpu.memory_space<vmem>>, vector<1x1x32xf32>
    %51 = vector.shape_cast %50 : vector<1x1x32xf32> to vector<1x32xf32>
    %52 = vector.broadcast %51 : vector<1x32xf32> to vector<8x32xf32>
    %53 = arith.addf %49, %52 : vector<8x32xf32>
    %c1_i32 = arith.constant 1 : i32
    %54 = arith.cmpi slt, %arg1, %c1_i32 : i32
    %55 = arith.extui %54 : i1 to i32
    %c0_i32_23 = arith.constant 0 : i32
    %56 = arith.cmpi ne, %55, %c0_i32_23 : i32
    scf.if %56 {
      %cst_26 = arith.constant 0.000000e+00 : f32
      %60 = vector.broadcast %cst_26 : f32 to vector<8x32xf32>
      %61 = arith.maximumf %53, %60 : vector<8x32xf32>
      %c0_27 = arith.constant 0 : index
      %c0_28 = arith.constant 0 : index
      %62 = vector.load %arg10[%c0_27, %c0_28] : memref<8x32xf32, #tpu.memory_space<vmem>>, vector<8x32xf32>
      tpu.vector_store %arg10[%c0_27, %c0_28], %61 {strides = array<i32>} : memref<8x32xf32, #tpu.memory_space<vmem>>, vector<8x32xf32>,
    } else {
    }
    %c1_i32_24 = arith.constant 1 : i32
    %57 = arith.cmpi eq, %arg1, %c1_i32_24 : i32
    %58 = arith.extui %57 : i1 to i32
    %c0_i32_25 = arith.constant 0 : i32
    %59 = arith.cmpi ne, %58, %c0_i32_25 : i32
    scf.if %59 {
      %c0_26 = arith.constant 0 : index
      %c0_27 = arith.constant 0 : index
      %c0_28 = arith.constant 0 : index
      %60 = vector.load %arg3[%c0_26, %c0_27, %c0_28] : memref<1x1x8xf32, #tpu.memory_space<vmem>>, vector<1x1x8xf32>
      %61 = vector.shape_cast %60 : vector<1x1x8xf32> to vector<1x8xf32>
      %cst_29 = arith.constant dense<0.000000e+00> : vector<1x32xf32>
      %62 = tpu.matmul %61, %53, %cst_29 {dimension_numbers = #tpu.dot_dimension_numbers<[1], [0], [0], [1], [0, 0, 1, 1], [], []>} : vector<1x8xf32>, vector<8x32xf32>, vector<1x32xf32> -> vector<1x32xf32>
      %c0_30 = arith.constant 0 : index
      %c0_31 = arith.constant 0 : index
      %c0_32 = arith.constant 0 : index
      %63 = vector.load %arg9[%c0_30, %c0_31, %c0_32] : memref<1x1x32xf32, #tpu.memory_space<vmem>>, vector<1x1x32xf32>
      %64 = vector.shape_cast %63 : vector<1x1x32xf32> to vector<1x32xf32>
      %65 = vector.shape_cast %62 : vector<1x32xf32> to vector<1x1x32xf32>
      tpu.vector_store %arg9[%c0_30, %c0_31, %c0_32], %65 {strides = array<i32>} : memref<1x1x32xf32, #tpu.memory_space<vmem>>, vector<1x1x32xf32>,
    } else {
    }
    return
  }
  func.func @transform_0(%arg0: i32, %arg1: i32) -> (i32, i32) {
    %c0_i32 = arith.constant 0 : i32
    %c0_i32_0 = arith.constant 0 : i32
    return %arg0, %c0_i32 : i32, i32
  }
  func.func @transform_1(%arg0: i32, %arg1: i32) -> (i32, i32, i32) {
    %c0_i32 = arith.constant 0 : i32
    %c0_i32_0 = arith.constant 0 : i32
    %c0_i32_1 = arith.constant 0 : i32
    return %arg0, %c0_i32, %c0_i32_0 : i32, i32, i32
  }
  func.func @transform_2(%arg0: i32, %arg1: i32) -> (i32, i32) {
    %c0_i32 = arith.constant 0 : i32
    %c0_i32_0 = arith.constant 0 : i32
    %c0_i32_1 = arith.constant 0 : i32
    return %c0_i32, %c0_i32_0 : i32, i32
  }
  func.func @transform_3(%arg0: i32, %arg1: i32) -> (i32, i32, i32) {
    %c0_i32 = arith.constant 0 : i32
    %c0_i32_0 = arith.constant 0 : i32
    %c0_i32_1 = arith.constant 0 : i32
    return %arg1, %c0_i32, %c0_i32_0 : i32, i32, i32
  }
  func.func @transform_4(%arg0: i32, %arg1: i32) -> (i32, i32, i32) {
    %c0_i32 = arith.constant 0 : i32
    %c0_i32_0 = arith.constant 0 : i32
    %c0_i32_1 = arith.constant 0 : i32
    return %arg1, %c0_i32, %c0_i32_0 : i32, i32, i32
  }
  func.func @transform_5(%arg0: i32, %arg1: i32) -> (i32, i32, i32, i32, i32) {
    %c0_i32 = arith.constant 0 : i32
    %c0_i32_0 = arith.constant 0 : i32
    %c0_i32_1 = arith.constant 0 : i32
    %c0_i32_2 = arith.constant 0 : i32
    return %arg1, %arg0, %c0_i32, %c0_i32_0, %c0_i32_1 : i32, i32, i32, i32, i32
  }
  func.func @transform_6(%arg0: i32, %arg1: i32) -> (i32, i32, i32) {
    %c0_i32 = arith.constant 0 : i32
    %c0_i32_0 = arith.constant 0 : i32
    %c0_i32_1 = arith.constant 0 : i32
    return %arg1, %c0_i32, %c0_i32_0 : i32, i32, i32
  }
  func.func @transform_7(%arg0: i32, %arg1: i32) -> (i32, i32, i32) {
    %c0_i32 = arith.constant 0 : i32
    %c0_i32_0 = arith.constant 0 : i32
    %c0_i32_1 = arith.constant 0 : i32
    return %arg0, %c0_i32, %c0_i32_0 : i32, i32, i32
  }
}

</mosaic_0001>

<bundles_post_ra>
// kernel: gat_embedder_forward.1
= control target key start
LH: loop header
LB: loop body
LE: loop exit
PB: predicated region body
PF: predicated region fallthrough
CT: control target
= control target key end

     0   :  { %s1538_s0 = inlined_call_operand.vmem [shape: f32[16,32], index: 0, kind: input, shape index: {}]   ;;  %s1539_s1 = inlined_call_operand.vmem [shape: f32[2,1,8], index: 1, kind: input, shape index: {}]   ;;  %s1540_s2 = inlined_call_operand.vmem [shape: bf16[32,32], index: 2, kind: input, shape index: {}]   ;;  %s1541_s3 = inlined_call_operand.vmem [shape: f32[2,32,32], index: 3, kind: input, shape index: {}]   ;;  %s1542_s4 = inlined_call_operand.vmem [shape: f32[2,32,8], index: 4, kind: input, shape index: {}]   ;;  %s1543_s5 = inlined_call_operand.vmem [shape: bf16[2,2,8,4,8], index: 5, kind: input, shape index: {}]   ;;  %s1544_s6 = inlined_call_operand.vmem [shape: f32[2,1,32], index: 6, kind: input, shape index: {}]   ;;  %s1545_s7 = inlined_call_operand.hbm [shape: f32[2,1,32], index: 7, kind: output, shape index: {}]  }
   0x1   :  { %1557 = sst [smem:[#allocation16_spill]] %s1538_s0 }
   0x2   :  { %1558 = sst [smem:[#allocation17_spill]] %s1545_s7 }
   0x3   :  { %12 = vsyncpa [#allocation4], 0 }
   0x4   :  { %14 = vsyncpa [#allocation4 + $0x1], 0  ;;  %s1276_s24 = smov 0   ;;  %s1278_s25 = smov 0  }
   0x5   :  { %s1280_s26 = smov 0   ;;  %s1282_s27 = smov 0  }
   0x6   :  { %s1284_s28 = smov 0   ;;  %s1286_s29 = smov 0  }
   0x7   :  { %s1288_s30 = smov 0   ;;  %s1290_s8 = smov 0  }
   0x8 LB: > { %1559 = sst [smem:[#allocation6_spill]] %s1202_s24  ;;  %s991_s9 = sadd.s32 4294967295, %s1230_s8   ;;  %s1230_s8 = sphi %s1290_s8, %s20_s8   ;;  %s1226_s30 = sphi %s1288_s30, %s1585_s30   ;;  %s1222_s29 = sphi %s1286_s29, %s1584_s29   ;;  %s1218_s28 = sphi %s1284_s28, %s1583_s28   ;;  %s1214_s27 = sphi %s1282_s27, %s1582_s27   ;;  %s1210_s26 = sphi %s1280_s26, %s1581_s26   ;;  %s1206_s25 = sphi %s1278_s25, %s1587_s25   ;;  %s1202_s24 = sphi %s1276_s24, %s1586_s24  }
   0x9   : > { %1560 = sst [smem:[#allocation7_spill]] %s1210_s26  ;;  %s992_s10 = sadd.s32 4294967294, %s1230_s8  }
   0xa   : > { %1561 = sst [smem:[#allocation8_spill]] %s1222_s29  ;;  %s29_s11 = sadd.s32 1, %s1222_s29 }
   0xb   : > { %1562 = sst [smem:[#allocation9_spill]] %s1226_s30  ;;  %p30_p0 = scmp.ge.s32.totalorder %s29_s11, 2 }
   0xc   : > { %1563 = sst [smem:[#allocation10_spill]] %s1230_s8  ;;  %s32_s12 = sadd.s32 1, %s1226_s30 }
   0xd   : > { %p228_p1 = scmp.ne.s32.totalorder %s1210_s26, %s1206_s25  ;;  %p229_p2 = scmp.eq.s32.totalorder %s991_s9, 3 }
   0xe   : > { %s1589_s11 = smov (%p30_p0, %s29_s11), 0  ;;  %s1591_s12 = smov (!%p30_p0, %s32_s12), %s1226_s30 }
   0xf   : > { %1564 = sst [smem:[#allocation11_spill]] %s1589_s11  ;;  %p1325_p3 = por %p229_p2, %p228_p1 }
  0x10   : > { %p234_p4 = scmp.ne.s32.totalorder %s1206_s25, %s1202_s24  ;;  %p34_p5 = scmp.ge.s32.totalorder %s1591_s12, 2 }
  0x11   : > { %s1565_s13 = scalar_select %p1325_p3, 1, 0 }
  0x12   : > { %p235_p6 = scmp.eq.s32.totalorder %s992_s10, 3  ;;  %p995_p7 = scmp.ge.s32.totalorder %s1230_s8, 1 }
  0x13   : > { %1566 = sst [smem:[#allocation12_spill]] %s1565_s13  ;;  %p303_p8 = scmp.lt.s32.totalorder %s1230_s8, 5 }
  0x14   : > { %s1593_s12 = smov (%p34_p5, %s1591_s12), 0  ;;  %p1335_p9 = por %p235_p6, %p234_p4 }
  0x15   : > { %1567 = sst [smem:[#allocation13_spill]] %s1593_s12  ;;  %p304_p10 = pnand %p995_p7, %p303_p8 }
  0x16   : > { %s1568_s14 = scalar_select %p1335_p9, 1, 0 }
  0x17   : > { %s215_s15 = ssub.s32 %s1226_s30, %s1593_s12  ;;  %s218_s16 = sadd.s32 1, %s1210_s26 }
  0x18   : > { %1569 = sst [smem:[#allocation14_spill]] %s1568_s14  ;;  %p216_p11 = scmp.eq.s32.totalorder %s215_s15, 0 }
  0x19   : > { %307 = sbr.rel (%p304_p10) target bundleno = 1307 (0x51b), region = 48  ;;  %p358_p12 = scmp.lt.s32.totalorder (!%p304_p10), %s1218_s28, 1 }
  0x1a   : > { %s1343_s17 = scalar_select %p216_p11, %s1210_s26, %s218_s16  }
  0x1b   : > { %p365_p13 = scmp.lt.s32.totalorder (!%p304_p10), %s1214_s27, 1  ;;  %s1571_s0 = sld [smem:[#allocation16_spill]] (!%p304_p10) }
  0x1c   : > { %1570 = sst [smem:[#allocation15_spill]] %s1343_s17  ;;  %s1572_s15 = sand.u32 (!%p304_p10), 1, %s1206_s25  }
  0x1d   : > { %p1004_p0 = scmp.ne.s32.totalorder (!%p304_p10), %s1214_s27, 0 }
  0x1e   : > { %s1349_s19 = scalar_select %p358_p12, %s1218_s28, 1 }
  0x1f   : > { %s1352_s20 = scalar_select %p365_p13, %s1214_s27, 1 }
  0x20   : > { %s996_s21 = sshll.u32 %s1349_s19, 3 }
  0x21   : > { %s361_s16 = scalar_lea.vmem %s1571_s0, %s996_s21  ;;  %s1013_s18 = sshll.u32 %s1352_s20, 5 }
  0x22   : > { %s369_s30 = scalar_lea.vmem %s1541_s3, %s1013_s18  ;;  %s374_s26 = scalar_lea.vmem %s1542_s4, %s1013_s18 }
  0x23   : > { %s1002_s14 = sshll.u32 %s1352_s20, 4  ;;  %s386_s13 = scalar_lea.vmem %s1544_s6, %s1352_s20 }
  0x24   : > { %s381_s22 = sadd.s32 %s1002_s14, %s996_s21  ;;  %s1381_s0 = scalar_lea.vmem [#allocation3], %s1572_s15 }
  0x25   : > { %s1003_s23 = sshll.u32 %s381_s22, 1  ;;  %391 = sbr.rel (%p1004_p0) target bundleno = 44 (0x2c), region = 52 }
  0x26   : > { %s1377_s10 = scalar_lea.vmem %s1543_s5, %s1003_s23 }
  0x2a   : > { %v392_v0 = vld [vmem:[%s361_s16] sm:$0xff]  ;;  %vm393_vm0 = vcmask 261120  }
  0x2b   : > { %394 = vst.msk [vmem:[#allocation2] sm:$0xff] %vm393_vm0, %v392_v0 }
  0x2c PF: > { %v399_v1 = vld [vmem:[%s369_s30 + $0x18] sm:$0xff]  ;;  %v398_v2 = vld [vmem:[%s369_s30 + $0x10] sm:$0xff]  ;;  %v397_v4 = vld [vmem:[%s369_s30 + $0x8] sm:$0xff]  ;;  %vm400_vm1 = vcmask 261120   ;;  %v504_v10 = vlaneseq  ;;  %vm772_vm2 = vcmask 1043456   ;;  %vm591_vm3 = vcmask 60416  }
  0x2d   : > { %416 = vmatpush.msra.mxu0 %v399_v1  ;;  %v427_v3 = vld [vmem:[%s374_s26 + $0x18] sm:$0xff]  ;;  %v426_v5 = vld [vmem:[%s374_s26 + $0x10] sm:$0xff]  ;;  %v425_v6 = vld [vmem:[%s374_s26 + $0x8] sm:$0xff]  ;;  %vm689_vm4 = vcmask 1041409   ;;  %vm692_vm5 = vcmask 1042434   ;;  %vm698_vm6 = vcmask 1044484  }
  0x2e   : > { %443 = vmatpush.msra.mxu1 %v427_v3  ;;  %v396_v7 = vld [vmem:[%s369_s30] sm:$0xff]  ;;  %v505_v11 = vshrl.u32 %v504_v10, 7  ;;  %v1023_v15 = vld [vmem:[%s1540_s2 + $0x8] sm:$0xff]   ;;  %vm695_vm7 = vcmask 1043459   ;;  %vm701_vm8 = vcmask 1045509   ;;  %vm704_vm9 = vcmask 1046534  }
  0x2f   : > { %417 = vmatpush.msra.mxu0 %v398_v2  ;;  %v424_v9 = vld [vmem:[%s374_s26] sm:$0xff]  ;;  %v1021_v18 = vunpack.c.l.bf16 %v1023_v15  ;;  %v1022_v19 = vunpack.c.h.bf16 %v1023_v15  ;;  %s1232_s26 = smov 124   ;;  %v492_v45 = vld [vmem:[%s1377_s10 + $0xa] sm:$0x3]  ;;  %v491_v49 = vld [vmem:[%s1377_s10 + $0x8] sm:$0x3] }
  0x30   : > { %444 = vmatpush.msra.mxu1 %v426_v5  ;;  %1102 = vset.pattern.permute.xlu2 %v505_v11  ;;  %v1016_v17 = vld [vmem:[%s1540_s2] sm:$0xff]   ;;  %v500_v50 = vunpack.c.l.bf16 %v492_v45  ;;  %v499_v56 = vunpack.c.l.bf16 %v491_v49  ;;  %v494_v2 = vld [vmem:[%s1377_s10 + $0xe] sm:$0x3]  ;;  %vm707_vm10 = vcmask 1047559   ;;  %s1233_s8 = smov 16   ;;  %s1234_s11 = smov 8  }
  0x31   : > { %418 = vmatpush.msra.mxu0 %v397_v4  ;;  %1101 = vset.pattern.permute.xlu1 %v505_v11  ;;  %v1017_v23 = vunpack.c.l.bf16 %v1016_v17  ;;  %v1018_v24 = vunpack.c.h.bf16 %v1016_v17  ;;  %v488_v46 = vld [vmem:[%s1377_s10 + $0x2] sm:$0x3]  ;;  %v487_v47 = vld [vmem:[%s1377_s10] sm:$0x3]  ;;  %v489_v53 = vld [vmem:[%s1377_s10 + $0x4] sm:$0x3] }
  0x32   : > { %v395_v8 = vld [vmem:[#allocation2] sm:$0xff]  ;;  %445 = vmatpush.msra.mxu1 %v425_v6  ;;  %1100 = vset.pattern.permute.xlu0 %v505_v11  ;;  %v496_v51 = vunpack.c.l.bf16 %v488_v46  ;;  %v495_v52 = vunpack.c.l.bf16 %v487_v47  ;;  %v497_v61 = vunpack.c.l.bf16 %v489_v53  ;;  %s1235_s12 = smov 24   ;;  %vm761_vm11 = vcmask 64512   ;;  %p1008_p1 = scmp.ge.s32.totalorder %s1214_s27, 1 }
  0x33   : > { %419 = vmatpush.msra.mxu0 %v396_v7  ;;  %vm763_vm12 = vcmask 130048   ;;  %vm765_vm13 = vcmask 195584  }
  0x34   : > { %1005 = vmatmul.msk.f32.vlgmr.msra.gmra.mxu0 %vm400_vm1, %v395_v8  ;;  %446 = vmatpush.msra.mxu1 %v424_v9 }
  0xb1   : > { %v421_v12 = vpop.f32.mrf.mxu0 }
  0xb2   : > { %v768_v13 = vpack.c.bf16 %v421_v12, %v421_v12  ;;  %1006 = vmatmul.msk.f32.vlgmr.msra.gmra.mxu1 %vm400_vm1, %v421_v12  ;;  %v490_v12 = vld [vmem:[%s1377_s10 + $0x6] sm:$0x3] }
  0xb4   : > { %v770_v14 = vunpack.c.l.b16 %v768_v13 }
  0xb6   : > { %v771_v16 = vpack.c.b16 %v770_v14, %v770_v14 }
  0xb8   : > { %v775_v20 = vsel %vm772_vm2, %v768_v13, %v771_v16  ;;  %v502_v13 = vunpack.c.l.bf16 %v494_v2 }
  0xb9   : > { %v781_v21 = vunpack.c.l.bf16 %v775_v20  ;;  %v782_v22 = vunpack.c.h.bf16 %v775_v20  ;;  %v498_v20 = vunpack.c.l.bf16 %v490_v12 }
  0xbb   : > { %v789_v25 = vmul.f32 %v1021_v18, %v781_v21  ;;  %v790_v26 = vmul.f32 %v1022_v19, %v782_v22  ;;  %v787_v28 = vmul.f32 %v1017_v23, %v781_v21  ;;  %v788_v29 = vmul.f32 %v1018_v24, %v782_v22 }
  0xbd   : > { %v792_v27 = vpack.c.bf16 %v790_v26, %v789_v25  ;;  %v791_v30 = vpack.c.bf16 %v788_v29, %v787_v28  ;;  %v493_v26 = vld [vmem:[%s1377_s10 + $0xc] sm:$0x3] }
  0xbf   : > { %806 = vmatpush.bf16.msra.mxu2 %v792_v27 }
  0xc3   : > { %807 = vmatpush.bf16.msra.mxu2 %v791_v30 }
 0x12f   : > { %v448_v31 = vpop.f32.mrf.mxu1 }
 0x130   : > { %452 = vrot.lane.b32.xlu0 %v448_v31, %s1232_s26  ;;  %v524_v32 = vperm.slane %v448_v31, 3  ;;  %v510_v33 = vperm.slane %v448_v31, 1  ;;  %v503_v34 = vperm.slane %v448_v31, 0  ;;  %v531_v35 = vperm.slane %v448_v31, 4 }
 0x131   : > { %v517_v36 = vperm.slane %v448_v31, 2  ;;  %v552_v37 = vperm.slane %v448_v31, 7  ;;  %v545_v38 = vperm.slane %v448_v31, 6  ;;  %v538_v39 = vperm.slane %v448_v31, 5 }
 0x132   : > { %529 = vperm.xlu2 %1102, %v524_v32   ;;  %515 = vperm.xlu1 %1101, %v510_v33   ;;  %v501_v32 = vunpack.c.l.bf16 %v493_v26 }
 0x138   : > { %508 = vperm.xlu0 %1100, %v503_v34  }
 0x13a   : > { %536 = vperm.xlu2 %1102, %v531_v35   ;;  %522 = vperm.xlu1 %1101, %v517_v36  }
 0x140   : > { %557 = vperm.xlu0 %1100, %v552_v37  }
 0x142   : > { %550 = vperm.xlu2 %1102, %v545_v38   ;;  %543 = vperm.xlu1 %1101, %v538_v39  }
 0x18c   : > { %v530_v43 = vpop.permute.xlu2 %529 }
 0x194   : > { %v537_v54 = vpop.permute.xlu2 %536 }
 0x19c   : > { %v551_v27 = vpop.permute.xlu2 %550 }
 0x1a2   : > { %v453_v40 = vpop.permute.xlu0 %452 }
 0x1a3   : > { %455 = vxpose.xlu1.b32.start.end [1/1] (short) (narrow) %v453_v40, 8 }
 0x1a4   : > { %v516_v41 = vpop.permute.xlu1 %515 }
 0x1aa   : > { %v509_v48 = vpop.permute.xlu0 %508 }
 0x1ac   : > { %v523_v42 = vpop.permute.xlu1 %522 }
 0x1b2   : > { %v558_v8 = vpop.permute.xlu0 %557 }
 0x1b4   : > { %v544_v44 = vpop.permute.xlu1 %543 }
 0x247   : > { %v471_v55 = vpop.trf.xlu1 }
 0x248   : > { %v564_v57 = vadd.f32 %v544_v44, %v471_v55  ;;  %v560_v58 = vadd.f32 %v516_v41, %v471_v55  ;;  %v559_v59 = vadd.f32 %v509_v48, %v471_v55  ;;  %v563_v60 = vadd.f32 %v537_v54, %v471_v55 }
 0x249   : > { %v561_v62 = vadd.f32 %v523_v42, %v471_v55  ;;  %v566_v14 = vadd.f32 %v558_v8, %v471_v55  ;;  %v562_v21 = vadd.f32 %v530_v43, %v471_v55  ;;  %v565_v33 = vadd.f32 %v551_v27, %v471_v55 }
 0x24a   : > { %v572_v63 = vadd.f32 %v564_v57, %v500_v50  ;;  %v568_v0 = vadd.f32 %v560_v58, %v496_v51  ;;  %v567_v1 = vadd.f32 %v559_v59, %v495_v52  ;;  %v571_v6 = vadd.f32 %v563_v60, %v499_v56 }
 0x24b   : > { %v569_v7 = vadd.f32 %v561_v62, %v497_v61  ;;  %v574_v23 = vadd.f32 %v566_v14, %v502_v13  ;;  %v570_v25 = vadd.f32 %v562_v21, %v498_v20  ;;  %v573_v36 = vadd.f32 %v565_v33, %v501_v32 }
 0x24c   : > { %v580_v3 = vmul.f32 0.2, %v572_v63  ;;  %v576_v4 = vmul.f32 0.2, %v568_v0  ;;  %v575_v5 = vmul.f32 0.2, %v567_v1 }
 0x24d   : > { %v579_v18 = vmul.f32 0.2, %v571_v6  ;;  %v577_v19 = vmul.f32 0.2, %v569_v7  ;;  %v582_v29 = vmul.f32 0.2, %v574_v23 }
 0x24e   : > { %v1398_v9 = vmax.f32 %v572_v63, %v580_v3  ;;  %v584_v10 = vmax.f32 %v568_v0, %v576_v4  ;;  %v583_v11 = vmax.f32 %v567_v1, %v575_v5  ;;  %v578_v31 = vmul.f32 0.2, %v570_v25 }
 0x24f   : > { %v587_v22 = vmax.f32 %v571_v6, %v579_v18  ;;  %v585_v24 = vmax.f32 %v569_v7, %v577_v19  ;;  %v590_v34 = vmax.f32 %v574_v23, %v582_v29  ;;  %v581_v39 = vmul.f32 0.2, %v573_v36 }
 0x250   : > { %v607_v15 = vsel %vm591_vm3, %v1398_v9, -inf  ;;  %v595_v16 = vsel %vm591_vm3, %v584_v10, -inf  ;;  %v592_v17 = vsel %vm591_vm3, %v583_v11, -inf  ;;  %v586_v35 = vmax.f32 %v570_v25, %v578_v31 }
 0x251   : > { %608 = vmax.xlane.f32.xlu1 %v607_v15  ;;  %596 = vmax.xlane.f32.xlu0 %v595_v16  ;;  %v604_v28 = vsel %vm591_vm3, %v587_v22, -inf  ;;  %v598_v30 = vsel %vm591_vm3, %v585_v24, -inf  ;;  %v613_v37 = vsel %vm591_vm3, %v590_v34, -inf  ;;  %v589_v40 = vmax.f32 %v573_v36, %v581_v39 }
 0x252   : > { %593 = vmax.xlane.f32.xlu2 %v592_v17  ;;  %v601_v38 = vsel %vm591_vm3, %v586_v35, -inf }
 0x253   : > { %v610_v41 = vsel %vm591_vm3, %v589_v40, -inf }
 0x259   : > { %605 = vmax.xlane.f32.xlu0 %v604_v28 }
 0x25a   : > { %599 = vmax.xlane.f32.xlu2 %v598_v30 }
 0x261   : > { %614 = vmax.xlane.f32.xlu0 %v613_v37 }
 0x262   : > { %602 = vmax.xlane.f32.xlu2 %v601_v38 }
 0x26a   : > { %611 = vmax.xlane.f32.xlu2 %v610_v41 }
 0x2c4   : > { %v597_v42 = vpop.xlane.xlu0 %596  ;;  %v609_v58 = vpop.xlane.xlu1 %608 }
 0x2c5   : > { %v594_v43 = vpop.xlane.xlu2 %593  ;;  %v617_v44 = vsub.f32 %v584_v10, %v597_v42  ;;  %v621_v62 = vsub.f32 %v1398_v9, %v609_v58 }
 0x2c6   : > { %v616_v45 = vsub.f32 %v583_v11, %v594_v43 }
 0x2c7   : > { %v626_v46 = vmul.f32 1.442695, %v617_v44  ;;  %v634_v1 = vmul.f32 1.442695, %v621_v62 }
 0x2c8   : > { %v624_v47 = vmul.f32 1.442695, %v616_v45 }
 0x2ca   : > { %1104 = vpow2.f32 %v624_v47 }
 0x2cb   : > { %1106 = vpow2.f32 %v626_v46 }
 0x2cc   : > { %v606_v49 = vpop.xlane.xlu0 %605 }
 0x2cd   : > { %v600_v48 = vpop.xlane.xlu2 %599  ;;  %v620_v53 = vsub.f32 %v587_v22, %v606_v49 }
 0x2ce   : > { %v618_v50 = vsub.f32 %v585_v24, %v600_v48 }
 0x2cf   : > { %v632_v57 = vmul.f32 1.442695, %v620_v53 }
 0x2d0   : > { %v1105_v51 = vpop.eup %1104  ;;  %v628_v52 = vmul.f32 1.442695, %v618_v50 }
 0x2d1   : > { %v1107_v54 = vpop.eup %1106  ;;  %v640_v55 = vsel %vm591_vm3, %v1105_v51, 0.0 }
 0x2d2   : > { %1108 = vpow2.f32 %v628_v52  ;;  %641 = vadd.xlane.f32.xlu2 %v640_v55  ;;  %v643_v56 = vsel %vm591_vm3, %v1107_v54, 0.0 }
 0x2d3   : > { %644 = vadd.xlane.f32.xlu0 %v643_v56  ;;  %1110 = vpow2.f32 %v632_v57 }
 0x2d4   : > { %v615_v2 = vpop.xlane.xlu0 %614 }
 0x2d5   : > { %v603_v59 = vpop.xlane.xlu2 %602  ;;  %v623_v7 = vsub.f32 %v590_v34, %v615_v2 }
 0x2d6   : > { %v619_v60 = vsub.f32 %v586_v35, %v603_v59 }
 0x2d7   : > { %v638_v9 = vmul.f32 1.442695, %v623_v7 }
 0x2d8   : > { %v1109_v61 = vpop.eup %1108  ;;  %v630_v63 = vmul.f32 1.442695, %v619_v60 }
 0x2d9   : > { %v646_v0 = vsel %vm591_vm3, %v1109_v61, 0.0  ;;  %v1111_v4 = vpop.eup %1110 }
 0x2da   : > { %1112 = vpow2.f32 %v630_v63  ;;  %647 = vadd.xlane.f32.xlu2 %v646_v0  ;;  %v652_v11 = vsel %vm591_vm3, %v1111_v4, 0.0 }
 0x2db   : > { %1114 = vpow2.f32 %v634_v1 }
 0x2dd   : > { %v612_v3 = vpop.xlane.xlu2 %611 }
 0x2de   : > { %v622_v5 = vsub.f32 %v589_v40, %v612_v3 }
 0x2e0   : > { %v1113_v6 = vpop.eup %1112  ;;  %v636_v8 = vmul.f32 1.442695, %v622_v5 }
 0x2e1   : > { %v649_v10 = vsel %vm591_vm3, %v1113_v6, 0.0  ;;  %v1115_v12 = vpop.eup %1114 }
 0x2e2   : > { %1116 = vpow2.f32 %v636_v8  ;;  %650 = vadd.xlane.f32.xlu0 %v649_v10  ;;  %653 = vadd.xlane.f32.xlu2 %v652_v11  ;;  %v655_v14 = vsel %vm591_vm3, %v1115_v12, 0.0 }
 0x2e3   : > { %1118 = vpow2.f32 %v638_v9 }
 0x2e8   : > { %v1117_v13 = vpop.eup %1116 }
 0x2e9   : > { %v658_v15 = vsel %vm591_vm3, %v1117_v13, 0.0  ;;  %v1419_v16 = vpop.eup %1118 }
 0x2ea   : > { %656 = vadd.xlane.f32.xlu0 %v655_v14  ;;  %659 = vadd.xlane.f32.xlu2 %v658_v15  ;;  %v661_v17 = vsel %vm591_vm3, %v1419_v16, 0.0 }
 0x2f2   : > { %662 = vadd.xlane.f32.xlu0 %v661_v17 }
 0x345   : > { %v642_v18 = vpop.xlane.xlu2 %641 }
 0x346   : > { %1120 = vrcp.f32 %v642_v18  ;;  %v645_v19 = vpop.xlane.xlu0 %644 }
 0x347   : > { %1122 = vrcp.f32 %v645_v19 }
 0x34c   : > { %v1121_v20 = vpop.eup %1120 }
 0x34d   : > { %v1123_v21 = vpop.eup %1122  ;;  %v648_v22 = vpop.xlane.xlu2 %647  ;;  %v1425_v24 = vmul.f32 %v1121_v20, %v1105_v51 }
 0x34e   : > { %v1423_v23 = vmul.f32 %v1123_v21, %v1107_v54  ;;  %1124 = vrcp.f32 %v648_v22 }
 0x34f   : > { %v727_v41 = vrot.slane %v1425_v24, 2  ;;  %v710_v44 = vrot.slane %v1425_v24, 1  ;;  %v744_v2 = vrot.slane %v1425_v24, 3 }
 0x350   : > { %v688_v25 = vrot.slane %v1423_v23, 7  ;;  %v728_v42 = vrot.slane %v1423_v23, 1  ;;  %v745_v3 = vrot.slane %v1423_v23, 2 }
 0x351   : > { %v711_v56 = vsel %vm689_vm4, %v1423_v23, %v710_v44 }
 0x352   : > { %v690_v26 = vsel %vm689_vm4, %v688_v25, %v1425_v24  ;;  %v729_v54 = vsel %vm689_vm4, %v728_v42, %v727_v41  ;;  %v746_v15 = vsel %vm689_vm4, %v745_v3, %v744_v2  ;;  %v1103_v41 = vld [vmem:[%s386_s13] ss:$0 sm:$0xff] }
 0x354   : > { %v1125_v27 = vpop.eup %1124 }
 0x355   : > { %v1430_v28 = vmul.f32 %v1125_v27, %v1109_v61  ;;  %v654_v29 = vpop.xlane.xlu2 %653  ;;  %v651_v30 = vpop.xlane.xlu0 %650 }
 0x356   : > { %1126 = vrcp.f32 %v654_v29 }
 0x357   : > { %v691_v31 = vrot.slane %v1430_v28, 6  ;;  %1128 = vrcp.f32 %v651_v30  ;;  %v712_v47 = vrot.slane %v1430_v28, 7  ;;  %v730_v55 = vsel %vm692_vm5, %v1430_v28, %v729_v54 }
 0x358   : > { %v747_v5 = vrot.slane %v1430_v28, 1 }
 0x359   : > { %v693_v32 = vsel %vm692_vm5, %v691_v31, %v690_v26  ;;  %v713_v59 = vsel %vm692_vm5, %v712_v47, %v711_v56 }
 0x35a   : > { %v748_v19 = vsel %vm692_vm5, %v747_v5, %v746_v15 }
 0x35c   : > { %v1127_v33 = vpop.eup %1126 }
 0x35d   : > { %v1129_v34 = vpop.eup %1128  ;;  %v1434_v35 = vmul.f32 %v1127_v33, %v1111_v4  ;;  %v660_v36 = vpop.xlane.xlu2 %659 }
 0x35e   : > { %v657_v37 = vpop.xlane.xlu0 %656  ;;  %v675_v38 = vmul.f32 %v1129_v34, %v1113_v6  ;;  %1130 = vrcp.f32 %v660_v36 }
 0x35f   : > { %1132 = vrcp.f32 %v657_v37  ;;  %v697_v40 = vrot.slane %v1434_v35, 4  ;;  %v733_v58 = vrot.slane %v1434_v35, 6  ;;  %v716_v60 = vrot.slane %v1434_v35, 5 }
 0x360   : > { %v694_v39 = vrot.slane %v675_v38, 5  ;;  %v731_v51 = vrot.slane %v675_v38, 7  ;;  %v714_v52 = vrot.slane %v675_v38, 6  ;;  %v749_v23 = vsel %vm695_vm7, %v675_v38, %v748_v19 }
 0x362   : > { %v696_v43 = vsel %vm695_vm7, %v694_v39, %v693_v32  ;;  %v732_v62 = vsel %vm695_vm7, %v731_v51, %v730_v55  ;;  %v715_v0 = vsel %vm695_vm7, %v714_v52, %v713_v59 }
 0x363   : > { %v699_v45 = vsel %vm698_vm6, %v697_v40, %v696_v43  ;;  %v734_v8 = vsel %vm698_vm6, %v733_v58, %v732_v62  ;;  %v717_v11 = vsel %vm698_vm6, %v716_v60, %v715_v0 }
 0x364   : > { %v1131_v46 = vpop.eup %1130 }
 0x365   : > { %v1133_v48 = vpop.eup %1132  ;;  %v678_v49 = vmul.f32 %v1131_v46, %v1117_v13 }
 0x366   : > { %v663_v50 = vpop.xlane.xlu0 %662  ;;  %v677_v53 = vmul.f32 %v1133_v48, %v1115_v12 }
 0x367   : > { %1134 = vrcp.f32 %v663_v50  ;;  %v703_v57 = vrot.slane %v678_v49, 2  ;;  %v737_v10 = vrot.slane %v678_v49, 4  ;;  %v720_v9 = vrot.slane %v678_v49, 3 }
 0x368   : > { %v700_v61 = vrot.slane %v677_v53, 3  ;;  %v735_v63 = vrot.slane %v677_v53, 5  ;;  %v718_v1 = vrot.slane %v677_v53, 4  ;;  %v752_v26 = vrot.slane %v677_v53, 6 }
 0x369   : > { %v754_v29 = vrot.slane %v678_v49, 5 }
 0x36a   : > { %v702_v4 = vsel %vm701_vm8, %v700_v61, %v699_v45  ;;  %v736_v13 = vsel %vm701_vm8, %v735_v63, %v734_v8  ;;  %v719_v14 = vsel %vm701_vm8, %v718_v1, %v717_v11 }
 0x36b   : > { %v705_v6 = vsel %vm704_vm9, %v703_v57, %v702_v4  ;;  %v738_v21 = vsel %vm704_vm9, %v737_v10, %v736_v13  ;;  %v721_v22 = vsel %vm704_vm9, %v720_v9, %v719_v14 }
 0x36d   : > { %v1135_v7 = vpop.eup %1134 }
 0x36e   : > { %v679_v12 = vmul.f32 %v1135_v7, %v1419_v16  ;;  %v750_v16 = vrot.slane %v1434_v35, 7 }
 0x370   : > { %v739_v17 = vrot.slane %v679_v12, 3  ;;  %v722_v18 = vrot.slane %v679_v12, 2  ;;  %v706_v20 = vrot.slane %v679_v12, 1  ;;  %v751_v28 = vsel %vm698_vm6, %v750_v16, %v749_v23 }
 0x371   : > { %v753_v30 = vsel %vm701_vm8, %v752_v26, %v751_v28  ;;  %v756_v31 = vrot.slane %v679_v12, 4 }
 0x372   : > { %v740_v24 = vsel %vm707_vm10, %v739_v17, %v738_v21  ;;  %v723_v25 = vsel %vm707_vm10, %v722_v18, %v721_v22  ;;  %v708_v27 = vsel %vm707_vm10, %v706_v20, %v705_v6  ;;  %v755_v32 = vsel %vm704_vm9, %v754_v29, %v753_v30 }
 0x373   : > { %741 = vrot.lane.b32.xlu0 %v740_v24, %s1233_s8  ;;  %724 = vrot.lane.b32.xlu2 %v723_v25, %s1234_s11  ;;  %v757_v33 = vsel %vm707_vm10, %v756_v31, %v755_v32 }
 0x37b   : > { %758 = vrot.lane.b32.xlu0 %v757_v33, %s1235_s12 }
 0x3cd   : > { %v725_v35 = vpop.permute.xlu2 %724 }
 0x3ce   : > { %v762_v36 = vsel %vm761_vm11, %v708_v27, %v725_v35 }
 0x3e5   : > { %v742_v34 = vpop.permute.xlu0 %741 }
 0x3e6   : > { %v764_v37 = vsel %vm763_vm12, %v762_v36, %v742_v34 }
 0x3ed   : > { %v759_v38 = vpop.permute.xlu0 %758 }
 0x3ee   : > { %v766_v39 = vsel %vm765_vm13, %v764_v37, %v759_v38 }
 0x3ef   : > { %v767_v40 = vpack.c.bf16 %v766_v39, %v766_v39 }
 0x3f1   : > { %1007 = vmatmul.msk.bf16.vlgmr.msra.gmra.mxu2 %vm400_vm1, %v767_v40 }
 0x474   : > { %v809_v42 = vpop.f32.mrf.mxu2 }
 0x475   : > { %v810_v43 = vadd.f32 %v1103_v41, %v809_v42 }
 0x478   : > { %816 = sbr.rel (%p1008_p1) target bundleno = 1152 (0x480), region = 56 }
 0x47c   : > { %v811_v44 = vpop.f32.mrf.mxu2 }
 0x47d   : > { %v817_v45 = vmax.f32 %v810_v43, 0.0 }
 0x47f   : > { %818 = vst.msk [vmem:[#allocation2] sm:$0xff] %vm400_vm1, %v817_v45 }
 0x480 PF: > { %p1009_p2 = scmp.ne.s32.totalorder %s1214_s27, 1 }
 0x481   : > { %s1573_s20 = scalar_lea.vmem (!%p1009_p2), %s1539_s1, %s1349_s19 }
 0x482   : > { %822 = sbr.rel (%p1009_p2) target bundleno = 1287 (0x507), region = 60 }
 0x487   : > { %842 = vmatpush.msra.mxu0 %v810_v43  ;;  %v823_v46 = vld [vmem:[%s1573_s20] sm:$0x1]  ;;  %vm847_vm14 = vcmask 253952  }
 0x488   : > { %1010 = vmatmul.msk.f32.vlgmr.msra.gmra.mxu0 %vm761_vm11, %v823_v46 }
 0x505   : > { %v844_v47 = vpop.f32.mrf.mxu0 }
 0x506   : > { %848 = vst.msk [vmem:[%s1381_s0] sm:$0x1] %vm847_vm14, %v844_v47 }
 0x507 PF: > { %s1574_s16 = sld [smem:[#allocation17_spill]]  ;;  %s860_s23 = sshll.u32 %s1381_s0, 4  ;;  %s861_s23 = int_to_ptr.vmem [resolvable:$true] %s860_s23 }
 0x508   : > { %s1576_s19 = sand.u32 1, %s1206_s25  }
 0x509   : > { %s850_s15 = scalar_lea.sflag [#allocation4], %s1576_s19 }
 0x50d   : > { %s858_s22 = scalar_lea.hbm %s1574_s16, %s1218_s28  ;;  %s1156_s26 = scalar_lea.hbm %s1574_s16, 2 }
 0x50e   : > { %s862_s10 = sshll.u32 %s858_s22, 4  ;;  %s863_s10 = int_to_ptr.hbm [resolvable:$true] %s862_s10 }
 0x50f   : > { %s1150_s7 = sshra.s32 %s863_s10, 4  ;;  %s1151_s7 = int_to_ptr.hbm [resolvable:$true] %s1150_s7 }
 0x510   : > { %s1152_s24 = scalar_lea.hbm %s1151_s7, 1  ;;  %p1157_p7 = scmp.lt.s32.totalorder %s1151_s7, %s1574_s16 }
 0x511   : > { %p1153_p4 = scmp.ne.s32.totalorder %s1151_s7, %s1152_s24  ;;  %p1158_p8 = scmp.lt.s32.totalorder %s1156_s26, %s1152_s24 }
 0x513   : > { %p1154_p5 = pnand %p1153_p4, %p1325_p3  ;;  %p1159_p10 = por %p1158_p8, %p1157_p7 }
 0x515   : > { %p1155_p6 = pneg %p1154_p5 }
 0x517   : > { %p1160_p11 = pnand %p1159_p10, %p1155_p6 }
 0x519   : > { %1163 = shalt.err (!%p1160_p11)
}
 0x51a   : > { %1024 = dma.vmem_to_hbm [thread:$0]  (%p1325_p3), %s861_s23, 16, %s863_s10, %s850_s15  }
 0x51b PF: > { %s1577_s0 = sld [smem:[#allocation10_spill]] }
 0x51c   : > { %s1578_s28 = sld [smem:[#allocation6_spill]] }
 0x521   : > { %p1030_p12 = scmp.ge.s32.totalorder %s1577_s0, 2 }
 0x522   : > { %s874_s14 = sand.u32 1, %s1578_s28  }
 0x523   : > { %p1027_p13 = pnand %p1030_p12, %p1335_p9  ;;  %s875_s17 = scalar_lea.sflag [#allocation4], %s874_s14 }
 0x525   : > { %p1028_p0 = pneg %p1027_p13 }
 0x527   : > { %1197 = dma.done.wait (%p1028_p0), %s875_s17, 16  }
 0x528   : > { %1199 = vsyncadd (%p1028_p0), %s875_s17, 4294967280  ;;  %s20_s8 = sadd.s32 1, %s1577_s0   ;;  %s1580_s18 = sld [smem:[#allocation7_spill]] }
 0x529   : > { %p17_p1 = scmp.ge.s32.totalorder %s20_s8, 6   ;;  %s1581_s26 = sld [smem:[#allocation15_spill]] }
 0x52a   : > { %s1582_s27 = sld [smem:[#allocation8_spill]]  ;;  %s1586_s24 = smov %s1206_s25 }
 0x52b   : > { %s1583_s28 = sld [smem:[#allocation9_spill]]  ;;  %19 = sbr.rel (!%p17_p1) target bundleno = 8 (0x8), region = 110 }
 0x52c   : > { %s1584_s29 = sld [smem:[#allocation11_spill]] }
 0x52d   : > { %s1585_s30 = sld [smem:[#allocation13_spill]] }
 0x52e   : > { %s1587_s25 = smov %s1580_s18 }
 0x530   :  { %880 = vsyncpa [#allocation4], 1 }
 0x531   :  { %882 = vsyncpa [#allocation4 + $0x1], 1 }

</bundles_post_ra>
